<compile_context>
chip_gen: v7x
topology: tpu7x:2x2x1
jax: 0.10.0
libtpu: 0.0.40
codegen_flags: <defaults>
</compile_context>

<pallas_src>
import functools
import math

import jax
import jax.numpy as jnp
from jax import lax
from jax.experimental import pallas as pl
from jax.experimental.pallas import tpu as pltpu

_EPS = 1e-8


def _apply_activation(x, name):
    """Static (trace-time) activation dispatch mirroring the PyTorch dict."""
    if name is None or name == "linear":
        return x
    if name == "relu":
        return jnp.maximum(x, 0.0)
    if name == "sigmoid":
        return 1.0 / (1.0 + jnp.exp(-x))
    if name == "tanh":
        return jnp.tanh(x)
    if name == "swish":
        return x * (1.0 / (1.0 + jnp.exp(-x)))
    if name == "leaky_relu":            # PyTorch default negative_slope = 0.01
        return jnp.where(x >= 0, x, 0.01 * x)
    if name == "elu":                   # PyTorch default alpha = 1.0
        return jnp.where(x > 0, x, jnp.exp(jnp.minimum(x, 0.0)) - 1.0)
    if name == "selu":
        alpha = 1.6732632423543772
        scale = 1.0507009873554805
        return scale * jnp.where(
            x > 0, x, alpha * (jnp.exp(jnp.minimum(x, 0.0)) - 1.0))
    raise ValueError(f"unsupported activation: {name!r}")


def _normalized_linear_kernel(x_ref, w_ref, scale_ref, *rest,
                              activation, has_bias):
    """One (i, j, k) grid step: acc += x_tile @ w_tile.T, epilogue at last k."""
    if has_bias:
        b_ref, o_ref, acc_ref = rest
    else:
        b_ref = None
        o_ref, acc_ref = rest

    k = pl.program_id(2)

    @pl.when(k == 0)
    def _init():
        acc_ref[...] = jnp.zeros_like(acc_ref)

    # MXU: contract the shared in_dim axis of both operands -> (TM, TN).
    # The stored (TN, TK) weight tile is used directly (no transpose needed).
    acc_ref[...] += lax.dot_general(
        x_ref[...], w_ref[...],
        dimension_numbers=(((1,), (1,)), ((), ())),
        preferred_element_type=jnp.float32)

    @pl.when(k == pl.num_programs(2) - 1)
    def _finalize():
        out = acc_ref[...] * scale_ref[...]          # (TM, TN) * (1, TN), f32
        if has_bias:
            out = out + b_ref[...]
        out = _apply_activation(out, activation)
        o_ref[...] = out.astype(o_ref.dtype)


def _round_up(v, m):
    return -(-v // m) * m


def _pad_cast_2d(a, rows, cols, dtype):
    """Cast and zero-pad only when actually needed (no gratuitous HBM copy)."""
    if a.dtype != dtype:
        a = a.astype(dtype)
    pr, pc = rows - a.shape[0], cols - a.shape[1]
    if pr or pc:
        a = jnp.pad(a, ((0, pr), (0, pc)))
    return a


def normalized_weights_linear(x, weight, bias, weight_scale, *,
                              weight_correction_scale=2 ** 0.5,
                              activation=None,
                              compute_dtype=jnp.bfloat16,
                              out_dtype=None,
                              tm_cap=512, tn_cap=512, tk_cap=1024):
    """Pallas TPU implementation of NormalizedWeightsLinear.forward.

    x:             (..., in_dim)
    weight:        (out_dim, in_dim)     (PyTorch nn.Linear layout)
    bias:          (out_dim,) or None
    weight_scale:  (1,) learnable scalar
    compute_dtype: dtype fed to the MXU (bf16 recommended; pass jnp.float32
                   for full-f32 matmul operands).
    out_dtype:     output dtype (defaults to x.dtype; bf16 halves writeback).
    tm/tn/tk caps: raise per generation (e.g. 1024 on v6e) if desired; the
                   scoped-VMEM limit is bumped automatically when needed.
    """
    in_dim = x.shape[-1]
    lead_shape = x.shape[:-1]
    x2d = x.reshape(-1, in_dim)
    B = x2d.shape[0]
    out_dim, in_dim_w = weight.shape
    assert in_dim == in_dim_w, (in_dim, in_dim_w)
    out_dtype = x.dtype if out_dtype is None else out_dtype
    has_bias = bias is not None

    # Exactly as in the PyTorch module's __init__:
    correction = float(weight_correction_scale) / math.sqrt(in_dim)

    # Hoisted per-output-row scale, computed once in full f32 from the
    # un-padded / un-cast weight (matches PyTorch's f32 mean(W^2) exactly).
    w_f32 = weight.astype(jnp.float32)
    inv = lax.rsqrt(jnp.mean(w_f32 * w_f32, axis=1) + _EPS)          # (out_dim,)
    ws = jnp.asarray(weight_scale, jnp.float32).reshape(())
    row_scale = (inv * (ws * correction)).reshape(1, out_dim)        # (1, out_dim)

    # --- tile sizes & zero padding (lane-dense output, aligned blocks) ---
    tm = min(tm_cap, _round_up(B, 16))
    tn = min(tn_cap, _round_up(out_dim, 128))
    tk = min(tk_cap, _round_up(in_dim, 128))
    m_pad = _round_up(B, tm)
    n_pad = _round_up(out_dim, tn)
    k_pad = _round_up(in_dim, tk)

    xp = _pad_cast_2d(x2d, m_pad, k_pad, compute_dtype)
    wp = _pad_cast_2d(weight, n_pad, k_pad, compute_dtype)
    sp = _pad_cast_2d(row_scale, 1, n_pad, jnp.float32)

    in_specs = [
        pl.BlockSpec((tm, tk), lambda i, j, k: (i, k)),        # x
        pl.BlockSpec((tn, tk), lambda i, j, k: (j, k)),        # weight
        pl.BlockSpec((1, tn), lambda i, j, k: (0, j)),         # row_scale
    ]
    args = [xp, wp, sp]
    if has_bias:
        bp = _pad_cast_2d(jnp.asarray(bias, jnp.float32).reshape(1, out_dim),
                          1, n_pad, jnp.float32)
        args.append(bp)
        in_specs.append(pl.BlockSpec((1, tn), lambda i, j, k: (0, j)))

    grid = (m_pad // tm, n_pad // tn, k_pad // tk)

    # Double-buffered inputs/outputs + f32 accumulator; only raise the scoped
    # VMEM limit when the default budget would be exceeded.
    csize = jnp.dtype(compute_dtype).itemsize
    osize = jnp.dtype(out_dtype).itemsize
    vmem_need = (2 * (tm * tk + tn * tk) * csize        # x / w double buffers
                 + 2 * tm * tn * osize                  # output double buffer
                 + tm * tn * 4                          # accumulator scratch
                 + 4 * 2 * tn * 4)                      # row_scale / bias bufs
    vmem_limit = None
    if vmem_need > (30 << 20):
        vmem_limit = int(min(vmem_need + (4 << 20), 96 << 20))

    kernel = functools.partial(_normalized_linear_kernel,
                               activation=activation, has_bias=has_bias)

    out_padded = pl.pallas_call(
        kernel,
        out_shape=jax.ShapeDtypeStruct((m_pad, n_pad), out_dtype),
        grid_spec=pltpu.PrefetchScalarGridSpec(
            num_scalar_prefetch=0,
            grid=grid,
            in_specs=in_specs,
            out_specs=pl.BlockSpec((tm, tn), lambda i, j, k: (i, j)),
            scratch_shapes=[pltpu.VMEM((tm, tn), jnp.float32)]),
        compiler_params=pltpu.CompilerParams(
            dimension_semantics=("parallel", "parallel", "arbitrary"),
            vmem_limit_bytes=vmem_limit),
    )(*args)

    out = out_padded[:B, :out_dim]
    return out.reshape(*lead_shape, out_dim)


def _reference(x, weight, bias, weight_scale, weight_correction_scale,
               activation):
    """Mirrors NormalizedWeightsLinear exactly (incl. /sqrt(in_dim) in init)."""
    in_dim = weight.shape[1]
    inv = lax.rsqrt(jnp.mean(weight ** 2, axis=1, keepdims=True) + _EPS)
    eff = weight_scale[0] * (weight_correction_scale / math.sqrt(in_dim))
    wn = weight * inv * eff
    out = jnp.dot(x, wn.T, precision=jax.lax.Precision.HIGHEST)
    if bias is not None:
        out = out + bias
    return _apply_activation(out, activation)


if __name__ == "__main__":
    key = jax.random.PRNGKey(0)
    k_w, k_x, k_w2, k_x2 = jax.random.split(key, 4)
    wcs = 2 ** 0.5

    # --- case 1/2: small demo shapes, bias + relu ---
    B, in_dim, out_dim = 8, 32, 64
    # kaiming_normal_(mode='fan_in', nonlinearity='relu'): std = sqrt(2/in_dim)
    weight = jax.random.normal(k_w, (out_dim, in_dim), jnp.float32) \
        * math.sqrt(2.0 / in_dim)
    bias = jnp.full((out_dim,), 0.1, jnp.float32)          # bias_init = 0.1
    weight_scale = jnp.full((1,), 1.3, jnp.float32)
    x = jax.random.normal(k_x, (B, in_dim), jnp.float32)
    ref = _reference(x, weight, bias, weight_scale, wcs, "relu")

    # exact-f32 operand path
    out_f32 = jax.block_until_ready(normalized_weights_linear(
        x, weight, bias, weight_scale, weight_correction_scale=wcs,
        activation="relu", compute_dtype=jnp.float32))
    assert out_f32.shape == (B, out_dim)
    assert bool(jnp.allclose(out_f32, ref, atol=1e-4, rtol=1e-4)), \
        f"f32 max err {jnp.max(jnp.abs(out_f32 - ref))}"

    # bf16 MXU-operand fast path (f32 accumulation / normalization)
    out_bf16 = jax.block_until_ready(normalized_weights_linear(
        x, weight, bias, weight_scale, weight_correction_scale=wcs,
        activation="relu", compute_dtype=jnp.bfloat16))
    assert bool(jnp.allclose(out_bf16, ref, atol=3e-2, rtol=3e-2)), \
        f"bf16 max err {jnp.max(jnp.abs(out_bf16 - ref))}"

    # --- case 3: no-bias / no-activation (nn.Linear replacement) on a real
    #     multi-tile grid (small tile caps force M, N and K > 1 tile + pad) ---
    B2, in2, out2 = 48, 320, 256
    weight2 = jax.random.normal(k_w2, (out2, in2), jnp.float32) \
        * math.sqrt(2.0 / in2)
    x2 = jax.random.normal(k_x2, (B2, in2), jnp.float32)
    out2_k = jax.block_until_ready(normalized_weights_linear(
        x2, weight2, None, weight_scale, weight_correction_scale=wcs,
        activation=None, compute_dtype=jnp.float32,
        tm_cap=16, tn_cap=128, tk_cap=128))          # grid = (3, 2, 3)
    ref2 = _reference(x2, weight2, None, weight_scale, wcs, None)
    assert out2_k.shape == (B2, out2)
    assert bool(jnp.allclose(out2_k, ref2, atol=5e-4, rtol=5e-4)), \
        f"tiled max err {jnp.max(jnp.abs(out2_k - ref2))}"

    print("KERNEL_OK")
</pallas_src>

<mosaic_0001>
module attributes {stable_mosaic.version = 11 : i64} {
  func.func @_normalized_linear_kernel(%arg0: i32, %arg1: i32, %arg2: i32, %arg3: memref<16x128xf32, #tpu.memory_space<vmem>>, %arg4: memref<128x128xf32, #tpu.memory_space<vmem>>, %arg5: memref<1x128xf32, #tpu.memory_space<vmem>>, %arg6: memref<1x128xf32, #tpu.memory_space<vmem>>, %arg7: memref<16x128xf32, #tpu.memory_space<vmem>>, %arg8: memref<16x128xf32, #tpu.memory_space<vmem>>) attributes {dimension_semantics = [#tpu.dimension_semantics<parallel>, #tpu.dimension_semantics<parallel>, #tpu.dimension_semantics<arbitrary>], iteration_bounds = array<i64: 1, 1, 1>, scalar_prefetch = 0 : i64, scratch_operands = 1 : i64, tpu.core_type = #tpu.core_type<tc>, window_params = [{transform_indices = @transform_0, window_bounds = array<i64: 16, 128>}, {transform_indices = @transform_1, window_bounds = array<i64: 128, 128>}, {transform_indices = @transform_2, window_bounds = array<i64: 1, 128>}, {transform_indices = @transform_3, window_bounds = array<i64: 1, 128>}, {transform_indices = @transform_4, window_bounds = array<i64: 16, 128>}]} {
    %c0_i32 = arith.constant 0 : i32
    %0 = arith.cmpi eq, %arg2, %c0_i32 : i32
    %1 = arith.extui %0 : i1 to i32
    %c0_i32_0 = arith.constant 0 : i32
    %2 = arith.cmpi ne, %1, %c0_i32_0 : i32
    scf.if %2 {
      %cst_10 = arith.constant 0.000000e+00 : f32
      %12 = vector.broadcast %cst_10 : f32 to vector<16x128xf32>
      %c0_11 = arith.constant 0 : index
      %c0_12 = arith.constant 0 : index
      %13 = vector.load %arg8[%c0_11, %c0_12] : memref<16x128xf32, #tpu.memory_space<vmem>>, vector<16x128xf32>
      tpu.vector_store %arg8[%c0_11, %c0_12], %12 {strides = array<i32>} : memref<16x128xf32, #tpu.memory_space<vmem>>, vector<16x128xf32>,
    } else {
    }
    %c0 = arith.constant 0 : index
    %c0_1 = arith.constant 0 : index
    %3 = vector.load %arg8[%c0, %c0_1] : memref<16x128xf32, #tpu.memory_space<vmem>>, vector<16x128xf32>
    %c0_2 = arith.constant 0 : index
    %c0_3 = arith.constant 0 : index
    %4 = vector.load %arg3[%c0_2, %c0_3] : memref<16x128xf32, #tpu.memory_space<vmem>>, vector<16x128xf32>
    %c0_4 = arith.constant 0 : index
    %c0_5 = arith.constant 0 : index
    %5 = vector.load %arg4[%c0_4, %c0_5] : memref<128x128xf32, #tpu.memory_space<vmem>>, vector<128x128xf32>
    %cst = arith.constant dense<0.000000e+00> : vector<16x128xf32>
    %6 = tpu.matmul %4, %5, %cst {dimension_numbers = #tpu.dot_dimension_numbers<[1], [1], [0], [0], [0, 0, 1, 0], [], []>} : vector<16x128xf32>, vector<128x128xf32>, vector<16x128xf32> -> vector<16x128xf32>
    %7 = arith.addf %3, %6 : vector<16x128xf32>
    %c0_6 = arith.constant 0 : index
    %c0_7 = arith.constant 0 : index
    %8 = vector.load %arg8[%c0_6, %c0_7] : memref<16x128xf32, #tpu.memory_space<vmem>>, vector<16x128xf32>
    tpu.vector_store %arg8[%c0_6, %c0_7], %7 {strides = array<i32>} : memref<16x128xf32, #tpu.memory_space<vmem>>, vector<16x128xf32>,
    %c0_i32_8 = arith.constant 0 : i32
    %9 = arith.cmpi eq, %arg2, %c0_i32_8 : i32
    %10 = arith.extui %9 : i1 to i32
    %c0_i32_9 = arith.constant 0 : i32
    %11 = arith.cmpi ne, %10, %c0_i32_9 : i32
    scf.if %11 {
      %c0_10 = arith.constant 0 : index
      %c0_11 = arith.constant 0 : index
      %12 = vector.load %arg8[%c0_10, %c0_11] : memref<16x128xf32, #tpu.memory_space<vmem>>, vector<16x128xf32>
      %c0_12 = arith.constant 0 : index
      %c0_13 = arith.constant 0 : index
      %13 = vector.load %arg5[%c0_12, %c0_13] : memref<1x128xf32, #tpu.memory_space<vmem>>, vector<1x128xf32>
      %14 = vector.broadcast %13 : vector<1x128xf32> to vector<16x128xf32>
      %15 = arith.mulf %12, %14 : vector<16x128xf32>
      %c0_14 = arith.constant 0 : index
      %c0_15 = arith.constant 0 : index
      %16 = vector.load %arg6[%c0_14, %c0_15] : memref<1x128xf32, #tpu.memory_space<vmem>>, vector<1x128xf32>
      %17 = vector.broadcast %16 : vector<1x128xf32> to vector<16x128xf32>
      %18 = arith.addf %15, %17 : vector<16x128xf32>
      %cst_16 = arith.constant 0.000000e+00 : f32
      %19 = vector.broadcast %cst_16 : f32 to vector<16x128xf32>
      %20 = arith.maximumf %18, %19 : vector<16x128xf32>
      %c0_17 = arith.constant 0 : index
      %c0_18 = arith.constant 0 : index
      %21 = vector.load %arg7[%c0_17, %c0_18] : memref<16x128xf32, #tpu.memory_space<vmem>>, vector<16x128xf32>
      tpu.vector_store %arg7[%c0_17, %c0_18], %20 {strides = array<i32>} : memref<16x128xf32, #tpu.memory_space<vmem>>, vector<16x128xf32>,
    } else {
    }
    return
  }
  func.func @transform_0(%arg0: i32, %arg1: i32, %arg2: i32) -> (i32, i32) {
    %c0_i32 = arith.constant 0 : i32
    return %arg0, %arg2 : i32, i32
  }
  func.func @transform_1(%arg0: i32, %arg1: i32, %arg2: i32) -> (i32, i32) {
    %c0_i32 = arith.constant 0 : i32
    return %arg1, %arg2 : i32, i32
  }
  func.func @transform_2(%arg0: i32, %arg1: i32, %arg2: i32) -> (i32, i32) {
    %c0_i32 = arith.constant 0 : i32
    %c0_i32_0 = arith.constant 0 : i32
    return %c0_i32, %arg1 : i32, i32
  }
  func.func @transform_3(%arg0: i32, %arg1: i32, %arg2: i32) -> (i32, i32) {
    %c0_i32 = arith.constant 0 : i32
    %c0_i32_0 = arith.constant 0 : i32
    return %c0_i32, %arg1 : i32, i32
  }
  func.func @transform_4(%arg0: i32, %arg1: i32, %arg2: i32) -> (i32, i32) {
    %c0_i32 = arith.constant 0 : i32
    return %arg0, %arg1 : i32, i32
  }
}

</mosaic_0001>

<bundles_post_ra>
// kernel: tpu_custom_call.1
= control target key start
LH: loop header
LB: loop body
LE: loop exit
PB: predicated region body
PF: predicated region fallthrough
CT: control target
= control target key end

     0   :  { %9 = vsyncpa [#allocation4], 0  ;;  %s441_s0 = inlined_call_operand.hbm [shape: f32[16,128], index: 0, kind: input, shape index: {}]   ;;  %s442_s1 = inlined_call_operand.hbm [shape: f32[128,128], index: 1, kind: input, shape index: {}]   ;;  %s443_s2 = inlined_call_operand.vmem [shape: f32[1,128], index: 2, kind: input, shape index: {}]   ;;  %s444_s3 = inlined_call_operand.vmem [shape: f32[1,128], index: 3, kind: input, shape index: {}]   ;;  %s445_s4 = inlined_call_operand.hbm [shape: f32[16,128], index: 4, kind: output, shape index: {}]  }
   0x1   :  { %10 = vsyncpa [#allocation7], 0 }
   0x2   :  { %11 = vsyncpa [#allocation5], 0  ;;  %s360_s15 = smov [#allocation3]   ;;  %s288_s19 = scalar_lea.hbm %s441_s0, 256 }
   0x3   :  { %s17_s16 = sshll.u32 %s360_s15, 4  ;;  %p289_p0 = scmp.ne.s32.totalorder %s441_s0, %s288_s19  ;;  %s18_s16 = int_to_ptr.vmem [resolvable:$true] %s17_s16 }
   0x4   :  { %p292_p1 = scmp.lt.u32.totalorder %s288_s19, %s441_s0 }
   0x6   :  { %p294_p2 = pnand %p292_p1, %p289_p0 }
   0x8   :  { %297 = shalt.err (!%p294_p2)
}
   0x9   :  { %s298_s24 = scalar_lea.vmem %s18_s16, 256  ;;  %p303_p4 = scmp.lt.s32.totalorder %s18_s16, %s18_s16 }
   0xa   :  { %p299_p3 = scmp.ne.s32.totalorder %s18_s16, %s298_s24  ;;  %p304_p5 = scmp.lt.s32.totalorder %s298_s24, %s298_s24 }
   0xc   :  { %p305_p6 = por %p304_p5, %p303_p4 }
   0xe   :  { %p306_p7 = pnand %p305_p6, %p299_p3 }
  0x10   :  { %309 = shalt.err (!%p306_p7)
}
  0x11   :  { %s361_s25 = smov 128   ;;  %s362_s26 = smov 8  }
  0x12   :  { %23 = dma.hbm_to_vmem [thread:$0]  %s441_s0, 256, %s18_s16, [#allocation4], %s361_s25, %s361_s25, %s362_s26  }
  0x13   :  { %s363_s29 = smov [#allocation6]   ;;  %s310_s7 = scalar_lea.hbm %s442_s1, 2048 }
  0x14   :  { %s29_s30 = sshll.u32 %s363_s29, 4  ;;  %p311_p8 = scmp.ne.s32.totalorder %s442_s1, %s310_s7  ;;  %s30_s30 = int_to_ptr.vmem [resolvable:$true] %s29_s30 }
  0x15   :  { %p314_p9 = scmp.lt.u32.totalorder %s310_s7, %s442_s1 }
  0x17   :  { %p316_p10 = pnand %p314_p9, %p311_p8 }
  0x19   :  { %319 = shalt.err (!%p316_p10)
}
  0x1a   :  { %s320_s12 = scalar_lea.vmem %s30_s30, 2048  ;;  %p325_p12 = scmp.lt.s32.totalorder %s30_s30, %s30_s30 }
  0x1b   :  { %p321_p11 = scmp.ne.s32.totalorder %s30_s30, %s320_s12  ;;  %p326_p13 = scmp.lt.s32.totalorder %s320_s12, %s320_s12 }
  0x1d   :  { %p327_p0 = por %p326_p13, %p325_p12 }
  0x1f   :  { %p328_p1 = pnand %p327_p0, %p321_p11 }
  0x21   :  { %331 = shalt.err (!%p328_p1)
}
  0x22   :  { %35 = dma.hbm_to_vmem [thread:$0]  %s442_s1, 2048, %s30_s30, [#allocation7], %s361_s25, %s361_s25, %s362_s26  }
  0x23   :  { %354 = dma.done.wait [#allocation4], 256  }
  0x24   :  { %355 = vsyncadd [#allocation4], 4294967040 }
  0x25   :  { %356 = dma.done.wait [#allocation7], 2048  }
  0x26   :  { %357 = vsyncadd [#allocation7], 4294965248  ;;  %v56_v0 = vld [vmem:[#allocation6] sm:$0xff]  ;;  %v57_v1 = vld [vmem:[#allocation6 + $0x8] sm:$0xff]  ;;  %s364_s17 = smov [#allocation8]  }
  0x27   :  { %v58_v2 = vld [vmem:[#allocation6 + $0x10] sm:$0xff]  ;;  %v251_v3 = vpack.c.bf16 %v57_v1, %v56_v0  ;;  %v59_v4 = vld [vmem:[#allocation6 + $0x18] sm:$0xff]  ;;  %v60_v7 = vld [vmem:[#allocation6 + $0x20] sm:$0xff]  ;;  %s183_s18 = sshll.u32 %s364_s17, 4  ;;  %s184_s18 = int_to_ptr.vmem [resolvable:$true] %s183_s18 }
  0x28   :  { %v255_v5 = vpack.c.bf16 %v59_v4, %v58_v2  ;;  %v54_v6 = vld [vmem:[#allocation3] sm:$0xff]  ;;  %v61_v8 = vld [vmem:[#allocation6 + $0x28] sm:$0xff]  ;;  %v63_v11 = vld [vmem:[#allocation6 + $0x38] sm:$0xff]  ;;  %s332_s19 = scalar_lea.vmem %s184_s18, 256  ;;  %p337_p3 = scmp.lt.s32.totalorder %s184_s18, %s184_s18 }
  0x29   :  { %252 = vmatprep.subr.bf16.mxu0 %v251_v3  ;;  %248 = vmatprep.mubr.f32.mxu0 %v54_v6  ;;  %v259_v9 = vpack.c.bf16 %v61_v8, %v60_v7  ;;  %v62_v10 = vld [vmem:[#allocation6 + $0x30] sm:$0xff]  ;;  %v64_v13 = vld [vmem:[#allocation6 + $0x40] sm:$0xff]  ;;  %v65_v14 = vld [vmem:[#allocation6 + $0x48] sm:$0xff]  ;;  %p333_p2 = scmp.ne.s32.totalorder %s184_s18, %s332_s19  ;;  %p338_p4 = scmp.lt.s32.totalorder %s332_s19, %s332_s19 }
  0x2a   :  { %254 = vmatpush3.bf16.xpose.msra.mxu0 %v251_v3  ;;  %v263_v12 = vpack.c.bf16 %v63_v11, %v62_v10  ;;  %v267_v15 = vpack.c.bf16 %v65_v14, %v64_v13  ;;  %v66_v16 = vld [vmem:[#allocation6 + $0x50] sm:$0xff]  ;;  %v67_v17 = vld [vmem:[#allocation6 + $0x58] sm:$0xff]  ;;  %v68_v19 = vld [vmem:[#allocation6 + $0x60] sm:$0xff] }
  0x2b   :  { %256 = vmatprep.subr.bf16.mxu0 %v255_v5  ;;  %v271_v18 = vpack.c.bf16 %v67_v17, %v66_v16  ;;  %v69_v20 = vld [vmem:[#allocation6 + $0x68] sm:$0xff]  ;;  %v70_v22 = vld [vmem:[#allocation6 + $0x70] sm:$0xff]  ;;  %v71_v23 = vld [vmem:[#allocation6 + $0x78] sm:$0xff]  ;;  %p339_p5 = por %p338_p4, %p337_p3 }
  0x2c   :  { %v275_v21 = vpack.c.bf16 %v69_v20, %v68_v19  ;;  %v279_v24 = vpack.c.bf16 %v71_v23, %v70_v22  ;;  %v55_v25 = vld [vmem:[#allocation3 + $0x8] sm:$0xff]  ;;  %v196_v26 = vld [vmem:[%s443_s2] ss:$0 sm:$0xff] }
  0x2d   :  { %v197_v28 = vld [vmem:[%s444_s3] ss:$0 sm:$0xff]  ;;  %p340_p6 = pnand %p339_p5, %p333_p2 }
  0x32   :  { %258 = vmatpush3.bf16.xpose.msra.mxu0 %v255_v5 }
  0x33   :  { %260 = vmatprep.subr.bf16.mxu0 %v259_v9 }
  0x3a   :  { %262 = vmatpush3.bf16.xpose.msra.mxu0 %v259_v9 }
  0x3b   :  { %264 = vmatprep.subr.bf16.mxu0 %v263_v12 }
  0x42   :  { %266 = vmatpush3.bf16.xpose.msra.mxu0 %v263_v12 }
  0x43   :  { %268 = vmatprep.subr.bf16.mxu0 %v267_v15 }
  0x4a   :  { %270 = vmatpush3.bf16.xpose.msra.mxu0 %v267_v15 }
  0x4b   :  { %272 = vmatprep.subr.bf16.mxu0 %v271_v18 }
  0x52   :  { %274 = vmatpush3.bf16.xpose.msra.mxu0 %v271_v18 }
  0x53   :  { %276 = vmatprep.subr.bf16.mxu0 %v275_v21 }
  0x5a   :  { %278 = vmatpush3.bf16.xpose.msra.mxu0 %v275_v21 }
  0x5b   :  { %280 = vmatprep.subr.bf16.mxu0 %v279_v24 }
  0x62   :  { %282 = vmatpush3.bf16.xpose.msra.mxu0 %v279_v24 }
  0x69   :  { %249 = vmatmul.mubr.f32.vlgmr.msra.gmra.mrb[0].mxu0 %v55_v25 }
 0x13c   :  { %v250_v27 = vpop.f32.mrb[0].mxu0 }
 0x13d   :  { %v164_v29 = vmul.f32 %v250_v27, %v196_v26  ;;  %v138_v30 = vpop.f32.mrb[1].mxu0 }
 0x13e   :  { %v163_v31 = vmul.f32 %v196_v26, %v138_v30 }
 0x13f   :  { %v173_v32 = vadd.f32 %v197_v28, %v164_v29 }
 0x140   :  { %v172_v33 = vadd.f32 %v197_v28, %v163_v31 }
 0x141   :  { %v175_v34 = vmax.f32 %v173_v32, 0.0 }
 0x142   :  { %v174_v35 = vmax.f32 %v172_v33, 0.0 }
 0x143   :  { %177 = vst [vmem:[#allocation8 + $0x8] sm:$0xff] %v175_v34 }
 0x144   :  { %176 = vst [vmem:[#allocation8] sm:$0xff] %v174_v35 }
 0x145   :  { %343 = shalt.err (!%p340_p6)
}
 0x146   :  { %s344_s20 = scalar_lea.hbm %s445_s4, 256 }
 0x147   :  { %p345_p7 = scmp.ne.s32.totalorder %s445_s4, %s344_s20  ;;  %p348_p8 = scmp.lt.u32.totalorder %s344_s20, %s445_s4 }
 0x149   :  { %p350_p9 = pnand %p348_p8, %p345_p7 }
 0x14b   :  { %353 = shalt.err (!%p350_p9)
}
 0x14c   :  { %189 = dma.vmem_to_hbm [thread:$0]  %s184_s18, 256, %s445_s4, [#allocation5], %s361_s25, %s361_s25, %s362_s26  }
 0x14d   :  { %358 = dma.done.wait [#allocation5], 256  }
 0x14e   :  { %359 = vsyncadd [#allocation5], 4294967040 }
 0x14f   :  { %193 = vsyncpa [#allocation4], 1 }
 0x150   :  { %194 = vsyncpa [#allocation7], 1 }
 0x151   :  { %195 = vsyncpa [#allocation5], 1 }

</bundles_post_ra>
